<compile_context>
chip_gen: v7x
topology: tpu7x:2x2x1
jax: 0.10.0
libtpu: 0.0.40
codegen_flags: <defaults>
</compile_context>

<pallas_src>
import functools

import jax
import jax.numpy as jnp
from jax.experimental import pallas as pl
from jax.experimental.pallas import tpu as pltpu


_MAX_TILE_L = 512  # lane-dense output tile; multiple of 128 (v5e) and 256 (v6e/v7x)


# ---------------------------------------------------------------------------
# Pallas kernel: fused im2col + matmul + bias for one (batch, L-tile) block.
# ---------------------------------------------------------------------------
def _make_conv1d_kernel(K, stride, tile_l, out_cl):
    """Builds the kernel body; K / stride / tile_l / out_cl are static."""

    def kernel(x_ref, w_ref, b_ref, o_ref):
        # x_ref: (L_pad, C_in)      whole padded sequence of this batch element
        # w_ref: (K, C_out, C_in)   per-tap weight matrices
        # b_ref: (C_out, 1) if out_cl else (1, C_out)
        # o_ref: (C_out, tile_l) if out_cl else (tile_l, C_out)
        t = pl.program_id(1)
        step = tile_l * stride
        base = t * step
        if step % 8 == 0:                       # alignment hint when valid
            base = pl.multiple_of(base, 8)

        acc = None
        for k in range(K):                      # K is small & static -> unrolled
            if stride == 1:
                x_k = x_ref[pl.ds(base + k, tile_l), :]           # (tile_l, C_in)
            else:
                x_k = x_ref[pl.ds(base + k, tile_l, stride), :]   # strided taps
            w_k = w_ref[k]                                        # (C_out, C_in)
            if out_cl:
                # (C_out, C_in) x (tile_l, C_in)^T -> (C_out, tile_l): L on lanes
                part = jax.lax.dot_general(
                    w_k, x_k, (((1,), (1,)), ((), ())),
                    preferred_element_type=jnp.float32)
            else:
                # (tile_l, C_in) x (C_out, C_in)^T -> (tile_l, C_out): NLC out
                part = jax.lax.dot_general(
                    x_k, w_k, (((1,), (1,)), ((), ())),
                    preferred_element_type=jnp.float32)
            acc = part if acc is None else acc + part

        o_ref[...] = (acc + b_ref[...]).astype(o_ref.dtype)

    return kernel


def _conv1d_pallas(x_nlc, weight, bias, stride, pad, out_cl):
    """One Conv1d layer (groups=1) matching torch.nn.Conv1d semantics.

    x_nlc:  (B, L, C_in)       channels-last activations
    weight: (C_out, C_in, K)
    bias:   (C_out,)
    returns (B, C_out, L_out) if out_cl else (B, L_out, C_out)
    """
    B, L, C_in = x_nlc.shape
    C_out, _, K = weight.shape

    L_conv = L + 2 * pad
    L_out = (L_conv - K) // stride + 1
    assert L_out >= 1, "sequence too short for this kernel/stride/pad"

    # L_out tiling: lane-dense tiles when long, otherwise one full-extent tile.
    if L_out <= _MAX_TILE_L:
        tile_l, nt = L_out, 1
    else:
        tile_l = _MAX_TILE_L
        nt = -(-L_out // tile_l)
    L_out_pad = tile_l * nt

    # Zero-pad once in HBM: conv padding + right padding so every tile's taps
    # stay in bounds (extra output positions are sliced off afterwards).
    L_in_needed = (L_out_pad - 1) * stride + K
    pad_right = pad + max(0, L_in_needed - L_conv)
    if pad > 0 or pad_right > 0:
        x_nlc = jnp.pad(x_nlc, ((0, 0), (pad, pad_right), (0, 0)))
    L_pad = x_nlc.shape[1]

    # Per-tap weights: w_taps[k] = weight[:, :, k]  -> (K, C_out, C_in)
    w_taps = jnp.transpose(weight, (2, 0, 1))
    b2 = bias.reshape(C_out, 1) if out_cl else bias.reshape(1, C_out)

    kernel = _make_conv1d_kernel(K, stride, tile_l, out_cl)

    if out_cl:
        out_shape = jax.ShapeDtypeStruct((B, C_out, L_out_pad), x_nlc.dtype)
        out_spec = pl.BlockSpec((None, C_out, tile_l), lambda b, t: (b, 0, t))
    else:
        out_shape = jax.ShapeDtypeStruct((B, L_out_pad, C_out), x_nlc.dtype)
        out_spec = pl.BlockSpec((None, tile_l, C_out), lambda b, t: (b, t, 0))

    out = pl.pallas_call(
        kernel,
        out_shape=out_shape,
        grid=(B, nt),
        in_specs=[
            # Whole padded sequence of one batch element; block index is
            # constant along t, so it is DMA'd once per batch element and
            # reused across all L tiles.
            # TODO(synk): for very long sequences split this block with
            # explicit halo handling to bound VMEM (v7x has 64 MiB).
            pl.BlockSpec((None, L_pad, C_in), lambda b, t: (b, 0, 0)),
            pl.BlockSpec((K, C_out, C_in), lambda b, t: (0, 0, 0)),
            pl.BlockSpec(b2.shape, lambda b, t: (0, 0)),
        ],
        out_specs=out_spec,
        compiler_params=pltpu.CompilerParams(
            dimension_semantics=("parallel", "arbitrary")),
    )(x_nlc, w_taps, b2)

    if L_out_pad != L_out:
        out = out[:, :, :L_out] if out_cl else out[:, :L_out, :]
    return out


# ---------------------------------------------------------------------------
# StdConv1d: parameter construction + forward (mirrors the PyTorch module).
# ---------------------------------------------------------------------------
def init_stdconv1d_params(key, nin, nout, n_layers=1, kern=3, bias=True):
    """Deterministic synthetic parameters with the same shapes as the module."""
    params = []
    in_chan = nin
    layer_defs = []
    if n_layers > 1:
        for i in range(n_layers - 1):
            out_chan = in_chan // (i + 1)
            layer_defs.append((in_chan, out_chan))
            in_chan = out_chan
    layer_defs.append((in_chan, nout))

    for (ci, co) in layer_defs:
        key, kw, kb = jax.random.split(key, 3)
        fan_in = ci * kern
        bound = 1.0 / jnp.sqrt(jnp.float32(fan_in))
        w = jax.random.uniform(kw, (co, ci, kern), jnp.float32, -bound, bound)
        b = (jax.random.uniform(kb, (co,), jnp.float32, -bound, bound)
             if bias else jnp.zeros((co,), jnp.float32))
        params.append({"weight": w, "bias": b})
    return params


def stdconv1d_forward(params, x, *, stride=1, pad=0, batch_first=True):
    """Forward pass of StdConv1d.

    x: (B, L, C_in) if batch_first else (B, C_in, L)
    returns (B, C_out, L_out)  (PyTorch Conv1d output layout)
    """
    # Activations are kept channels-last (B, L, C) between layers; when
    # batch_first the input is already in that layout (no transpose at all).
    if not batch_first:
        x = jnp.transpose(x, (0, 2, 1))
    n = len(params)
    for i, p in enumerate(params):
        last = (i == n - 1)
        x = _conv1d_pallas(x, p["weight"], p["bias"], stride, pad, out_cl=last)
        # TODO(synk): nn.Dropout(0.1) between inner layers is treated as
        # identity (inference semantics); no stochastic drop implemented.
    return x


# ---------------------------------------------------------------------------
# Reference (plain JAX) for sanity checks.
# ---------------------------------------------------------------------------
def _conv1d_ref(x_ncl, weight, bias, stride, pad):
    y = jax.lax.conv_general_dilated(
        x_ncl, weight, window_strides=(stride,), padding=[(pad, pad)],
        dimension_numbers=("NCH", "OIH", "NCH"))
    return y + bias[None, :, None]


def _stdconv1d_ref(params, x, *, stride=1, pad=0, batch_first=True):
    if batch_first:
        x = jnp.transpose(x, (0, 2, 1))
    for p in params:
        x = _conv1d_ref(x, p["weight"], p["bias"], stride, pad)
    return x


if __name__ == "__main__":
    key = jax.random.PRNGKey(0)
    kx1, kp1, kx2, kp2 = jax.random.split(key, 4)

    # --- Test 1: module defaults (n_layers=1, kern=3, stride=1, pad=0). ---
    B, L, NIN, NOUT, KERN = 2, 16, 4, 8, 3
    x1 = jax.random.normal(kx1, (B, L, NIN), jnp.float32)      # batch_first input
    params1 = init_stdconv1d_params(kp1, NIN, NOUT, n_layers=1, kern=KERN, bias=True)

    fwd1 = jax.jit(functools.partial(stdconv1d_forward, stride=1, pad=0,
                                     batch_first=True))
    out1 = fwd1(params1, x1)
    jax.block_until_ready(out1)
    ref1 = _stdconv1d_ref(params1, x1, stride=1, pad=0, batch_first=True)
    assert out1.shape == (B, NOUT, L - KERN + 1), out1.shape
    assert jnp.allclose(out1, ref1, atol=1e-5, rtol=1e-5)

    # --- Test 2: two layers, pad=1, longer sequence (exercises lane-dense
    #     L-out tiling, ragged tail handling, and NLC intermediate layout). ---
    B2, L2, NIN2, NOUT2 = 2, 700, 8, 6
    x2 = jax.random.normal(kx2, (B2, L2, NIN2), jnp.float32)
    params2 = init_stdconv1d_params(kp2, NIN2, NOUT2, n_layers=2, kern=KERN, bias=True)

    fwd2 = jax.jit(functools.partial(stdconv1d_forward, stride=1, pad=1,
                                     batch_first=True))
    out2 = fwd2(params2, x2)
    jax.block_until_ready(out2)
    ref2 = _stdconv1d_ref(params2, x2, stride=1, pad=1, batch_first=True)
    assert out2.shape == (B2, NOUT2, L2), out2.shape
    assert jnp.allclose(out2, ref2, atol=1e-4, rtol=1e-4)

    print("KERNEL_OK")
</pallas_src>

<mosaic_0001>
module attributes {stable_mosaic.version = 11 : i64} {
  func.func @kernel(%arg0: i32, %arg1: i32, %arg2: memref<1x16x4xf32, #tpu.memory_space<vmem>>, %arg3: memref<3x8x4xf32, #tpu.memory_space<vmem>>, %arg4: memref<8x1xf32, #tpu.memory_space<vmem>>, %arg5: memref<1x8x14xf32, #tpu.memory_space<vmem>>) attributes {dimension_semantics = [#tpu.dimension_semantics<parallel>, #tpu.dimension_semantics<arbitrary>], iteration_bounds = array<i64: 2, 1>, scalar_prefetch = 0 : i64, scratch_operands = 0 : i64, tpu.core_type = #tpu.core_type<tc>, window_params = [{transform_indices = @transform_0, window_bounds = array<i64: 1, 16, 4>}, {pipeline_mode = #tpu.pipeline_mode<synchronous>, transform_indices = @transform_1, window_bounds = array<i64: 3, 8, 4>}, {pipeline_mode = #tpu.pipeline_mode<synchronous>, transform_indices = @transform_2, window_bounds = array<i64: 8, 1>}, {transform_indices = @transform_3, window_bounds = array<i64: 1, 8, 14>}]} {
    %c14_i32 = arith.constant 14 : i32
    %0 = arith.muli %arg1, %c14_i32 : i32
    %c0_i32 = arith.constant 0 : i32
    %1 = arith.addi %0, %c0_i32 : i32
    %c0 = arith.constant 0 : index
    %2 = arith.index_cast %1 : i32 to index
    %c0_0 = arith.constant 0 : index
    %3 = vector.load %arg2[%c0, %2, %c0_0] : memref<1x16x4xf32, #tpu.memory_space<vmem>>, vector<1x14x4xf32>
    %4 = vector.shape_cast %3 : vector<1x14x4xf32> to vector<14x4xf32>
    %c0_1 = arith.constant 0 : index
    %c0_2 = arith.constant 0 : index
    %c0_3 = arith.constant 0 : index
    %5 = vector.load %arg3[%c0_1, %c0_2, %c0_3] : memref<3x8x4xf32, #tpu.memory_space<vmem>>, vector<1x8x4xf32>
    %6 = vector.shape_cast %5 : vector<1x8x4xf32> to vector<8x4xf32>
    %cst = arith.constant dense<0.000000e+00> : vector<8x14xf32>
    %7 = tpu.matmul %6, %4, %cst {dimension_numbers = #tpu.dot_dimension_numbers<[1], [1], [0], [0], [0, 0, 1, 0], [], []>} : vector<8x4xf32>, vector<14x4xf32>, vector<8x14xf32> -> vector<8x14xf32>
    %c1_i32 = arith.constant 1 : i32
    %8 = arith.addi %0, %c1_i32 : i32
    %c0_4 = arith.constant 0 : index
    %9 = arith.index_cast %8 : i32 to index
    %c0_5 = arith.constant 0 : index
    %10 = vector.load %arg2[%c0_4, %9, %c0_5] : memref<1x16x4xf32, #tpu.memory_space<vmem>>, vector<1x14x4xf32>
    %11 = vector.shape_cast %10 : vector<1x14x4xf32> to vector<14x4xf32>
    %c1 = arith.constant 1 : index
    %c0_6 = arith.constant 0 : index
    %c0_7 = arith.constant 0 : index
    %12 = vector.load %arg3[%c1, %c0_6, %c0_7] : memref<3x8x4xf32, #tpu.memory_space<vmem>>, vector<1x8x4xf32>
    %13 = vector.shape_cast %12 : vector<1x8x4xf32> to vector<8x4xf32>
    %cst_8 = arith.constant dense<0.000000e+00> : vector<8x14xf32>
    %14 = tpu.matmul %13, %11, %cst_8 {dimension_numbers = #tpu.dot_dimension_numbers<[1], [1], [0], [0], [0, 0, 1, 0], [], []>} : vector<8x4xf32>, vector<14x4xf32>, vector<8x14xf32> -> vector<8x14xf32>
    %15 = arith.addf %7, %14 : vector<8x14xf32>
    %c2_i32 = arith.constant 2 : i32
    %16 = arith.addi %0, %c2_i32 : i32
    %c0_9 = arith.constant 0 : index
    %17 = arith.index_cast %16 : i32 to index
    %c0_10 = arith.constant 0 : index
    %18 = vector.load %arg2[%c0_9, %17, %c0_10] : memref<1x16x4xf32, #tpu.memory_space<vmem>>, vector<1x14x4xf32>
    %19 = vector.shape_cast %18 : vector<1x14x4xf32> to vector<14x4xf32>
    %c2 = arith.constant 2 : index
    %c0_11 = arith.constant 0 : index
    %c0_12 = arith.constant 0 : index
    %20 = vector.load %arg3[%c2, %c0_11, %c0_12] : memref<3x8x4xf32, #tpu.memory_space<vmem>>, vector<1x8x4xf32>
    %21 = vector.shape_cast %20 : vector<1x8x4xf32> to vector<8x4xf32>
    %cst_13 = arith.constant dense<0.000000e+00> : vector<8x14xf32>
    %22 = tpu.matmul %21, %19, %cst_13 {dimension_numbers = #tpu.dot_dimension_numbers<[1], [1], [0], [0], [0, 0, 1, 0], [], []>} : vector<8x4xf32>, vector<14x4xf32>, vector<8x14xf32> -> vector<8x14xf32>
    %23 = arith.addf %15, %22 : vector<8x14xf32>
    %c0_14 = arith.constant 0 : index
    %c0_15 = arith.constant 0 : index
    %24 = vector.load %arg4[%c0_14, %c0_15] : memref<8x1xf32, #tpu.memory_space<vmem>>, vector<8x1xf32>
    %25 = vector.broadcast %24 : vector<8x1xf32> to vector<8x14xf32>
    %26 = arith.addf %23, %25 : vector<8x14xf32>
    %c0_16 = arith.constant 0 : index
    %c0_17 = arith.constant 0 : index
    %c0_18 = arith.constant 0 : index
    %27 = vector.load %arg5[%c0_16, %c0_17, %c0_18] : memref<1x8x14xf32, #tpu.memory_space<vmem>>, vector<1x8x14xf32>
    %28 = vector.shape_cast %27 : vector<1x8x14xf32> to vector<8x14xf32>
    %29 = vector.shape_cast %26 : vector<8x14xf32> to vector<1x8x14xf32>
    tpu.vector_store %arg5[%c0_16, %c0_17, %c0_18], %29 {strides = array<i32>} : memref<1x8x14xf32, #tpu.memory_space<vmem>>, vector<1x8x14xf32>,
    return
  }
  func.func @transform_0(%arg0: i32, %arg1: i32) -> (i32, i32, i32) {
    %c0_i32 = arith.constant 0 : i32
    %c0_i32_0 = arith.constant 0 : i32
    %c0_i32_1 = arith.constant 0 : i32
    return %arg0, %c0_i32, %c0_i32_0 : i32, i32, i32
  }
  func.func @transform_1(%arg0: i32, %arg1: i32) -> (i32, i32, i32) {
    %c0_i32 = arith.constant 0 : i32
    %c0_i32_0 = arith.constant 0 : i32
    %c0_i32_1 = arith.constant 0 : i32
    %c0_i32_2 = arith.constant 0 : i32
    return %c0_i32, %c0_i32_0, %c0_i32_1 : i32, i32, i32
  }
  func.func @transform_2(%arg0: i32, %arg1: i32) -> (i32, i32) {
    %c0_i32 = arith.constant 0 : i32
    %c0_i32_0 = arith.constant 0 : i32
    %c0_i32_1 = arith.constant 0 : i32
    return %c0_i32, %c0_i32_0 : i32, i32
  }
  func.func @transform_3(%arg0: i32, %arg1: i32) -> (i32, i32, i32) {
    %c0_i32 = arith.constant 0 : i32
    %c0_i32_0 = arith.constant 0 : i32
    return %arg0, %c0_i32, %arg1 : i32, i32, i32
  }
}

</mosaic_0001>

<bundles_post_ra>
// kernel: stdconv1d_forward.1
= control target key start
LH: loop header
LB: loop body
LE: loop exit
PB: predicated region body
PF: predicated region fallthrough
CT: control target
= control target key end

     0   :  { %8 = vsyncpa [#allocation3], 0  ;;  %s916_s0 = inlined_call_operand.vmem [shape: f32[2,16,4], index: 0, kind: input, shape index: {}]   ;;  %s917_s1 = inlined_call_operand.vmem [shape: f32[3,8,4], index: 1, kind: input, shape index: {}]   ;;  %s918_s2 = inlined_call_operand.vmem [shape: f32[8,1], index: 2, kind: input, shape index: {}]   ;;  %s919_s3 = inlined_call_operand.hbm [shape: f32[2,8,14], index: 3, kind: output, shape index: {}]  }
   0x1   :  { %10 = vsyncpa [#allocation3 + $0x1], 0  ;;  %s774_s12 = smov 0   ;;  %s776_s13 = smov 0  }
   0x2   :  { %s778_s14 = smov 0   ;;  %s780_s15 = smov 0  }
   0x3   :  { %s782_s16 = smov 0   ;;  %s784_s17 = smov 0  }
   0x4 LB: > { %s539_s18 = sadd.s32 4294967295, %s747_s17   ;;  %s540_s19 = sadd.s32 4294967294, %s747_s17   ;;  %s747_s17 = sphi %s784_s17, %s16_s17   ;;  %s743_s16 = sphi %s782_s16, %s928_s16   ;;  %s739_s15 = sphi %s780_s15, %s927_s15   ;;  %s735_s14 = sphi %s778_s14, %s926_s14   ;;  %s731_s13 = sphi %s776_s13, %s925_s13   ;;  %s727_s12 = sphi %s774_s12, %s924_s12  }
   0x5   : > { %s28_s20 = sadd.s32 1, %s743_s16  ;;  %s105_s21 = sadd.s32 1, %s735_s14 }
   0x6   : > { %p30_p0 = scmp.ge.s32.totalorder %s28_s20, 2  ;;  %p115_p1 = scmp.ne.s32.totalorder %s735_s14, %s731_s13 }
   0x7   : > { %p116_p2 = scmp.eq.s32.totalorder %s539_s18, 1  ;;  %p121_p3 = scmp.ne.s32.totalorder %s731_s13, %s727_s12 }
   0x8   : > { %s930_s20 = smov (%p30_p0, %s28_s20), 0  ;;  %p122_p5 = scmp.eq.s32.totalorder %s540_s19, 1 }
   0x9   : > { %p814_p4 = por %p116_p2, %p115_p1  ;;  %s100_s23 = ssub.s32 %s743_s16, %s930_s20 }
   0xa   : > { %p543_p6 = scmp.ge.s32.totalorder %s747_s17, 1  ;;  %p103_p7 = scmp.eq.s32.totalorder %s100_s23, 0 }
   0xb   : > { %p821_p8 = por %p122_p5, %p121_p3  ;;  %p154_p9 = scmp.lt.s32.totalorder %s747_s17, 3 }
   0xc   : > { %s827_s25 = scalar_select %p103_p7, %s735_s14, %s105_s21  }
   0xd   : > { %p155_p10 = pnand %p543_p6, %p154_p9 }
   0xe   : > { %p178_p11 = scmp.lt.s32.totalorder (!%p155_p10), %s739_s15, 1  ;;  %v749_v0 = vmov (!%p155_p10), 0.0|0.0   ;;  %vm194_vm0 = vcmask (!%p155_p10), 31744   ;;  %vm750_vm1 = vmmov (!%p155_p10), 0   ;;  %v751_v1 = vmov (!%p155_p10), 0.0   ;;  %v439_v2 = vld [vmem:[%s918_s2] sm:$0xff] (!%p155_p10) }
   0xf   : > { %158 = sbr.rel (%p155_p10) target bundleno = 274 (0x112), region = 32  ;;  %597 = vmatprep.subr.bf16.mxu0 (!%p155_p10), %v749_v0  ;;  %601 = vmatprep.subr.bf16.mxu1 (!%p155_p10), %v749_v0  ;;  %v752_v3 = vmov (!%p155_p10), 0   ;;  %vm841_vm2 = vmpackc.low (!%p155_p10), %vm194_vm0, %vm194_vm0  ;;  %v549_v13 = vld [vmem:[%s917_s1 + $0x8] sm:$0xff] (!%p155_p10)  ;;  %v187_v15 = vld [vmem:[%s917_s1] sm:$0xff] (!%p155_p10)  ;;  %s175_s18 = sand.u32 (!%p155_p10), 1, %s731_s13   ;;  %vm446_vm3 = vcmask (!%p155_p10), 113664  }
  0x10   : > { %580 = vmatprep.mubr.msk.f32.mxu0 (!%p155_p10), %vm750_vm1, %v751_v1  ;;  %587 = vmatprep.mubr.msk.f32.mxu1 (!%p155_p10), %vm750_vm1, %v751_v1  ;;  %v558_v16 = vld [vmem:[%s917_s1 + $0x10] sm:$0xff] (!%p155_p10)  ;;  %s544_s19 = sshll.u32 (!%p155_p10), %s175_s18, 3  ;;  %s563_s21 = sshll.u32 (!%p155_p10), %s739_s15, 7 }
  0x11   : > { %668 = vset.pattern.permute.xlu0 (!%p155_p10), %v752_v3  ;;  %s177_s23 = scalar_lea.vmem (!%p155_p10), [#allocation2], %s544_s19  ;;  %s449_s30 = scalar_lea.sflag (!%p155_p10), [#allocation3], %s175_s18 }
  0x12   : > { %442 = vperm.xlu0 (!%p155_p10), %668, %v439_v2  }
  0x16   : > { %s179_s26 = scalar_select %p178_p11, %s739_s15, 1 }
  0x17   : > { %s753_s15 = smov [#allocation2]  }
  0x18   : > { %s566_s29 = sshll.u32 %s179_s26, 4  ;;  %s463_s26 = sshll.u32 %s177_s23, 4  ;;  %s871_s26 = int_to_ptr.vmem [resolvable:$true] %s463_s26 }
  0x19   : > { %s182_s5 = scalar_lea.vmem %s916_s0, %s566_s29  ;;  %s869_s29 = scalar_lea.hbm %s919_s3, %s563_s21 }
  0x1a   : > { %v547_v5 = vld [vmem:[%s182_s5 + $0x1] sm:$0xff]  ;;  %v548_v6 = vld [vmem:[%s182_s5 + $0x9] sm:$0x3f]  ;;  %s669_s4 = scalar_lea.vmem %s871_s26, 128 }
  0x1b   : > { %v185_v7 = vld [vmem:[%s182_s5] sm:$0xff]  ;;  %v598_v8 = vpack.c.bf16 %v548_v6, %v547_v5  ;;  %v186_v9 = vld [vmem:[%s182_s5 + $0x8] sm:$0x3f]  ;;  %p670_p12 = scmp.ne.s32.totalorder %s871_s26, %s669_s4 }
  0x1c   : > { %v602_v10 = vpack.c.bf16 %v186_v9, %v185_v7  ;;  %v556_v11 = vld [vmem:[%s182_s5 + $0x2] sm:$0xff]  ;;  %v557_v12 = vld [vmem:[%s182_s5 + $0xa] sm:$0x3f]  ;;  %s673_s5 = sshll.u32 %s753_s15, 4  ;;  %s674_s5 = int_to_ptr.vmem [resolvable:$false] %s673_s5 }
  0x1d   : > { %600 = vmatpush3.bf16.xpose.msk.msra.mxu0 %vm841_vm2, %v598_v8  ;;  %v606_v14 = vpack.c.bf16 %v557_v12, %v556_v11  ;;  %p671_p13 = pnand %p670_p12, %p814_p4  ;;  %s675_s6 = scalar_lea.vmem %s674_s5, 256 }
  0x1e   : > { %604 = vmatpush3.bf16.xpose.msk.msra.mxu1 %vm841_vm2, %v602_v10  ;;  %605 = vmatprep.subr.bf16.mxu0 %v749_v0  ;;  %p676_p1 = scmp.lt.s32.totalorder %s871_s26, %s674_s5  ;;  %p677_p2 = scmp.lt.s32.totalorder %s675_s6, %s669_s4 }
  0x1f   : > { %p672_p0 = pneg %p671_p13 }
  0x20   : > { %p678_p3 = por %p677_p2, %p676_p1 }
  0x22   : > { %p679_p5 = pnand %p678_p3, %p672_p0 }
  0x24   : > { %581 = vmatmul.mubr.msk.f32.vlgmr.msra.gmra.mrb[0].mxu0 %vm194_vm0, %v549_v13 }
  0x25   : > { %588 = vmatmul.mubr.msk.f32.vlgmr.msra.gmra.mrb[0].mxu1 %vm194_vm0, %v187_v15  ;;  %608 = vmatpush3.bf16.xpose.msk.msra.mxu0 %vm841_vm2, %v606_v14 }
  0x26   : > { %594 = vmatprep.mubr.msk.f32.mxu0 %vm750_vm1, %v751_v1 }
  0x2c   : > { %595 = vmatmul.mubr.msk.f32.vlgmr.msra.gmra.mrb[2].mxu0 %vm194_vm0, %v558_v16 }
  0x91   : > { %v443_v23 = vpop.permute.xlu0 %442 }
  0xf7   : > { %v270_v17 = vpop.f32.mrb[0].mxu0 }
  0xf8   : > { %v582_v18 = vpop.f32.mrb[1].mxu0  ;;  %v349_v19 = vpop.f32.mrb[0].mxu1 }
  0xf9   : > { %v350_v20 = vadd.f32 %v349_v19, %v270_v17  ;;  %v589_v21 = vpop.f32.mrb[1].mxu1 }
  0xff   : > { %v434_v22 = vpop.f32.mrb[2].mxu0 }
 0x100   : > { %v438_v24 = vadd.f32 %v434_v22, %v350_v20  ;;  %v596_v25 = vpop.f32.mrb[3].mxu0 }
 0x102   : > { %v445_v26 = vadd.f32 %v443_v23, %v438_v24 }
 0x104   : > { %447 = vst.msk [vmem:[%s177_s23] sm:$0xff] %vm446_vm3, %v445_v26 }
 0x105   : > { %682 = shalt.err (!%p679_p5)
}
 0x106   : > { %s683_s7 = scalar_lea.hbm %s869_s29, 128  ;;  %s687_s10 = scalar_lea.hbm %s919_s3, 256 }
 0x107   : > { %p684_p6 = scmp.ne.s32.totalorder %s869_s29, %s683_s7  ;;  %p688_p10 = scmp.lt.u32.totalorder %s869_s29, %s919_s3 }
 0x108   : > { %p689_p11 = scmp.lt.u32.totalorder %s687_s10, %s683_s7  ;;  %p691_p13 = scmp.lt.u32.totalorder %s683_s7, %s869_s29 }
 0x109   : > { %p685_p7 = pnand %p684_p6, %p814_p4 }
 0x10a   : > { %p690_p12 = por %p689_p11, %p688_p10 }
 0x10b   : > { %p686_p9 = pneg %p685_p7 }
 0x10c   : > { %p692_p0 = por %p691_p13, %p690_p12 }
 0x10e   : > { %p693_p1 = pnand %p692_p0, %p686_p9 }
 0x110   : > { %696 = shalt.err (!%p693_p1)
}
 0x111   : > { %609 = dma.vmem_to_hbm [thread:$0]  (%p814_p4), %s871_s26, 128, %s869_s29, %s449_s30  }
 0x112 PF: > { %p615_p2 = scmp.ge.s32.totalorder %s747_s17, 2  ;;  %s475_s19 = sand.u32 1, %s727_s12  }
 0x113   : > { %s476_s21 = scalar_lea.sflag [#allocation3], %s475_s19 }
 0x114   : > { %p612_p3 = pnand %p615_p2, %p821_p8 }
 0x116   : > { %722 = dma.done.wait (!%p612_p3), %s476_s21, 128  }
 0x117   : > { %724 = vsyncadd (!%p612_p3), %s476_s21, 4294967168  ;;  %s16_s17 = sadd.s32 1, %s747_s17   ;;  %s924_s12 = smov %s731_s13 }
 0x118   : > { %p13_p5 = scmp.ge.s32.totalorder %s16_s17, 4   ;;  %s925_s13 = smov %s735_s14 }
 0x119   : > { %s926_s14 = smov %s827_s25  ;;  %s927_s15 = smov %s743_s16 }
 0x11a   : > { %s928_s16 = smov %s930_s20  ;;  %15 = sbr.rel (!%p13_p5) target bundleno = 4 (0x4), region = 72 }
 0x121   :  { %481 = vsyncpa [#allocation3], 1 }
 0x122   :  { %483 = vsyncpa [#allocation3 + $0x1], 1 }

</bundles_post_ra>
